<compile_context>
chip_gen: v7x
topology: tpu7x:2x2x1
jax: 0.10.0
libtpu: 0.0.40
codegen_flags: <defaults>
</compile_context>

<pallas_src>
import jax
import jax.numpy as jnp
from jax import lax
from jax.experimental import pallas as pl
from jax.experimental.pallas import tpu as pltpu
import numpy as np


def _fuse_heads(w):
    """[H, d_in, d_out] -> [d_in, H*d_out]; column block h corresponds to head h."""
    H, d_in, d_out = w.shape
    return jnp.transpose(w, (1, 0, 2)).reshape(d_in, H * d_out)


def multi_head_attention_wrapper(x, wq, wk, wv, *, tq=None, tk=None):
    """
    x          : [B, T, d_in]
    wq, wk, wv : [H, d_in, d_out]   (per-head nn.Linear(d_in, d_out, bias=False))
    returns      [B, T, H*d_out]  == torch.cat([head(x) for head in heads], dim=-1)
    """
    B, T, d_in = x.shape
    H, _, d_out = wq.shape
    hd = H * d_out
    scale = 1.0 / (d_out ** 0.5)          # softmax(... / sqrt(d_k)) folded into q

    def _pick(t):
        if t is not None:
            return t
        for cand in (512, 256, 128, 64, 32, 16, 8):
            if T % cand == 0:
                return cand
        return T

    tq = _pick(tq)
    tk = _pick(tk)
    assert T % tq == 0 and T % tk == 0, "T must be divisible by the Q/KV tiles"
    nq = T // tq
    nk = T // tk

    wq_f = _fuse_heads(wq)
    wk_f = _fuse_heads(wk)
    wv_f = _fuse_heads(wv)

    def kernel(xq_ref, xkv_ref, wq_ref, wk_ref, wv_ref, o_ref,
               q_s, m_s, l_s, acc_s):
        qi = pl.program_id(1)
        ki = pl.program_id(2)

        @pl.when(ki == 0)
        def _init():
            q = jnp.dot(xq_ref[0], wq_ref[...],
                        preferred_element_type=jnp.float32)       # (tq, hd)
            q_s[...] = q * scale
            m_s[...] = jnp.full(m_s.shape, -jnp.inf, dtype=jnp.float32)
            l_s[...] = jnp.zeros(l_s.shape, dtype=jnp.float32)
            acc_s[...] = jnp.zeros(acc_s.shape, dtype=jnp.float32)

        # Skip KV tiles that lie entirely above the causal diagonal.
        @pl.when(ki * tk <= qi * tq + (tq - 1))
        def _compute():
            k = jnp.dot(xkv_ref[0], wk_ref[...],
                        preferred_element_type=jnp.float32)       # (tk, hd)
            v = jnp.dot(xkv_ref[0], wv_ref[...],
                        preferred_element_type=jnp.float32)       # (tk, hd)

            row = qi * tq + lax.broadcasted_iota(jnp.int32, (tq, tk), 0)
            col = ki * tk + lax.broadcasted_iota(jnp.int32, (tq, tk), 1)
            masked = col > row                                    # causal mask

            q_all = q_s[...]          # (tq, hd), already scaled
            m_prev_all = m_s[...]     # (tq, H)
            l_prev_all = l_s[...]     # (tq, H)
            acc_prev = acc_s[...]     # (tq, hd)

            m_cols, l_cols, acc_cols = [], [], []
            for h in range(H):        # static unroll; per-head MXU matmuls
                sl = slice(h * d_out, (h + 1) * d_out)
                q_h = q_all[:, sl]
                k_h = k[:, sl]
                v_h = v[:, sl]
                # scores = q_h @ k_h.T without materializing a transpose
                s = lax.dot_general(q_h, k_h, (((1,), (1,)), ((), ())),
                                    preferred_element_type=jnp.float32)
                s = jnp.where(masked, -jnp.inf, s)

                m_prev = m_prev_all[:, h:h + 1]
                l_prev = l_prev_all[:, h:h + 1]
                m_new = jnp.maximum(m_prev, jnp.max(s, axis=-1, keepdims=True))
                alpha = jnp.exp(m_prev - m_new)
                p = jnp.exp(s - m_new)
                l_new = alpha * l_prev + jnp.sum(p, axis=-1, keepdims=True)
                pv = jnp.dot(p, v_h, preferred_element_type=jnp.float32)

                m_cols.append(m_new)
                l_cols.append(l_new)
                acc_cols.append(alpha * acc_prev[:, sl] + pv)

            m_s[...] = jnp.concatenate(m_cols, axis=-1)
            l_s[...] = jnp.concatenate(l_cols, axis=-1)
            acc_s[...] = jnp.concatenate(acc_cols, axis=-1)

        @pl.when(ki == pl.num_programs(2) - 1)
        def _finalize():
            acc = acc_s[...]
            l_all = l_s[...]
            outs = []
            for h in range(H):
                sl = slice(h * d_out, (h + 1) * d_out)
                outs.append(acc[:, sl] *
                            pl.reciprocal(l_all[:, h:h + 1], approx=False))
            # Single lane-dense store of the full [tq, H*d_out] output block.
            o_ref[0] = jnp.concatenate(outs, axis=-1).astype(o_ref.dtype)

        # TODO(synk): training-mode nn.Dropout on attn_weights omitted (eval / p=0);
        # would need pltpu.prng_seed + pltpu.prng_random_bits inside the kernel.

    return pl.pallas_call(
        kernel,
        out_shape=jax.ShapeDtypeStruct((B, T, hd), x.dtype),
        grid_spec=pltpu.PrefetchScalarGridSpec(
            num_scalar_prefetch=0,
            grid=(B, nq, nk),
            in_specs=[
                pl.BlockSpec((1, tq, d_in), lambda b, qi, ki: (b, qi, 0)),  # x (Q rows)
                pl.BlockSpec((1, tk, d_in), lambda b, qi, ki: (b, ki, 0)),  # x (KV rows)
                pl.BlockSpec((d_in, hd), lambda b, qi, ki: (0, 0)),         # Wq fused
                pl.BlockSpec((d_in, hd), lambda b, qi, ki: (0, 0)),         # Wk fused
                pl.BlockSpec((d_in, hd), lambda b, qi, ki: (0, 0)),         # Wv fused
            ],
            out_specs=pl.BlockSpec((1, tq, hd), lambda b, qi, ki: (b, qi, 0)),
            scratch_shapes=[
                pltpu.VMEM((tq, hd), jnp.float32),   # scaled q for this Q tile
                pltpu.VMEM((tq, H), jnp.float32),    # running max per head
                pltpu.VMEM((tq, H), jnp.float32),    # running denominator per head
                pltpu.VMEM((tq, hd), jnp.float32),   # output accumulator
            ]),
        compiler_params=pltpu.CompilerParams(
            dimension_semantics=("parallel", "parallel", "arbitrary")),
    )(x, x, wq_f, wk_f, wv_f)


def _reference(x, wq, wk, wv):
    """Pure-JAX reference mirroring the PyTorch MultiHeadAttentionWrapper forward."""
    H = wq.shape[0]
    T = x.shape[1]
    d_k = wq.shape[-1]
    mask = jnp.triu(jnp.ones((T, T), dtype=bool), k=1)
    outs = []
    for h in range(H):
        q = x @ wq[h]
        k = x @ wk[h]
        v = x @ wv[h]
        s = jnp.einsum("btd,bsd->bts", q, k)
        s = jnp.where(mask[None], -jnp.inf, s)
        w = jax.nn.softmax(s / (d_k ** 0.5), axis=-1)
        outs.append(jnp.einsum("bts,bsd->btd", w, v))
    return jnp.concatenate(outs, axis=-1)


if __name__ == "__main__":
    # Small deterministic shapes; T=16 with 8-wide tiles exercises the online
    # softmax across multiple KV tiles and the causal tile-skip path.
    B, T, d_in, d_out, H = 2, 16, 8, 4, 2

    key = jax.random.PRNGKey(0)
    kx, kq, kk, kv = jax.random.split(key, 4)
    x = jax.random.uniform(kx, (B, T, d_in), dtype=jnp.float32)
    wq = jax.random.uniform(kq, (H, d_in, d_out), dtype=jnp.float32)
    wk = jax.random.uniform(kk, (H, d_in, d_out), dtype=jnp.float32)
    wv = jax.random.uniform(kv, (H, d_in, d_out), dtype=jnp.float32)

    out = multi_head_attention_wrapper(x, wq, wk, wv, tq=8, tk=8)
    out = jax.block_until_ready(out)

    ref = _reference(x, wq, wk, wv)
    assert out.shape == (B, T, H * d_out)
    np.testing.assert_allclose(np.asarray(out), np.asarray(ref), rtol=1e-5, atol=1e-5)

    print("KERNEL_OK")
</pallas_src>

<mosaic_0001>
module attributes {stable_mosaic.version = 11 : i64} {
  func.func @kernel(%arg0: i32, %arg1: i32, %arg2: i32, %arg3: memref<1x8x8xf32, #tpu.memory_space<vmem>>, %arg4: memref<1x8x8xf32, #tpu.memory_space<vmem>>, %arg5: memref<8x8xf32, #tpu.memory_space<vmem>>, %arg6: memref<8x8xf32, #tpu.memory_space<vmem>>, %arg7: memref<8x8xf32, #tpu.memory_space<vmem>>, %arg8: memref<1x8x8xf32, #tpu.memory_space<vmem>>, %arg9: memref<8x8xf32, #tpu.memory_space<vmem>>, %arg10: memref<8x2xf32, #tpu.memory_space<vmem>>, %arg11: memref<8x2xf32, #tpu.memory_space<vmem>>, %arg12: memref<8x8xf32, #tpu.memory_space<vmem>>) attributes {dimension_semantics = [#tpu.dimension_semantics<parallel>, #tpu.dimension_semantics<parallel>, #tpu.dimension_semantics<arbitrary>], iteration_bounds = array<i64: 2, 2, 2>, scalar_prefetch = 0 : i64, scratch_operands = 4 : i64, tpu.core_type = #tpu.core_type<tc>, window_params = [{transform_indices = @transform_0, window_bounds = array<i64: 1, 8, 8>}, {transform_indices = @transform_1, window_bounds = array<i64: 1, 8, 8>}, {pipeline_mode = #tpu.pipeline_mode<synchronous>, transform_indices = @transform_2, window_bounds = array<i64: 8, 8>}, {pipeline_mode = #tpu.pipeline_mode<synchronous>, transform_indices = @transform_3, window_bounds = array<i64: 8, 8>}, {pipeline_mode = #tpu.pipeline_mode<synchronous>, transform_indices = @transform_4, window_bounds = array<i64: 8, 8>}, {transform_indices = @transform_5, window_bounds = array<i64: 1, 8, 8>}]} {
    %c0_i32 = arith.constant 0 : i32
    %0 = arith.cmpi eq, %arg2, %c0_i32 : i32
    %1 = arith.extui %0 : i1 to i32
    %c0_i32_0 = arith.constant 0 : i32
    %2 = arith.cmpi ne, %1, %c0_i32_0 : i32
    scf.if %2 {
      %c0 = arith.constant 0 : index
      %c0_4 = arith.constant 0 : index
      %c0_5 = arith.constant 0 : index
      %12 = vector.load %arg3[%c0, %c0_4, %c0_5] : memref<1x8x8xf32, #tpu.memory_space<vmem>>, vector<1x8x8xf32>
      %13 = vector.shape_cast %12 : vector<1x8x8xf32> to vector<8x8xf32>
      %c0_6 = arith.constant 0 : index
      %c0_7 = arith.constant 0 : index
      %14 = vector.load %arg5[%c0_6, %c0_7] : memref<8x8xf32, #tpu.memory_space<vmem>>, vector<8x8xf32>
      %cst = arith.constant dense<0.000000e+00> : vector<8x8xf32>
      %15 = tpu.matmul %13, %14, %cst {dimension_numbers = #tpu.dot_dimension_numbers<[1], [0], [0], [1], [0, 0, 1, 1], [], []>} : vector<8x8xf32>, vector<8x8xf32>, vector<8x8xf32> -> vector<8x8xf32>
      %cst_8 = arith.constant 5.000000e-01 : f32
      %16 = vector.broadcast %cst_8 : f32 to vector<8x8xf32>
      %17 = arith.mulf %15, %16 : vector<8x8xf32>
      %c0_9 = arith.constant 0 : index
      %c0_10 = arith.constant 0 : index
      %18 = vector.load %arg9[%c0_9, %c0_10] : memref<8x8xf32, #tpu.memory_space<vmem>>, vector<8x8xf32>
      tpu.vector_store %arg9[%c0_9, %c0_10], %17 {strides = array<i32>} : memref<8x8xf32, #tpu.memory_space<vmem>>, vector<8x8xf32>,
      %cst_11 = arith.constant 0xFF800000 : f32
      %19 = vector.broadcast %cst_11 : f32 to vector<8x2xf32>
      %c0_12 = arith.constant 0 : index
      %c0_13 = arith.constant 0 : index
      %20 = vector.load %arg10[%c0_12, %c0_13] : memref<8x2xf32, #tpu.memory_space<vmem>>, vector<8x2xf32>
      tpu.vector_store %arg10[%c0_12, %c0_13], %19 {strides = array<i32>} : memref<8x2xf32, #tpu.memory_space<vmem>>, vector<8x2xf32>,
      %cst_14 = arith.constant 0.000000e+00 : f32
      %21 = vector.broadcast %cst_14 : f32 to vector<8x2xf32>
      %c0_15 = arith.constant 0 : index
      %c0_16 = arith.constant 0 : index
      %22 = vector.load %arg11[%c0_15, %c0_16] : memref<8x2xf32, #tpu.memory_space<vmem>>, vector<8x2xf32>
      tpu.vector_store %arg11[%c0_15, %c0_16], %21 {strides = array<i32>} : memref<8x2xf32, #tpu.memory_space<vmem>>, vector<8x2xf32>,
      %cst_17 = arith.constant 0.000000e+00 : f32
      %23 = vector.broadcast %cst_17 : f32 to vector<8x8xf32>
      %c0_18 = arith.constant 0 : index
      %c0_19 = arith.constant 0 : index
      %24 = vector.load %arg12[%c0_18, %c0_19] : memref<8x8xf32, #tpu.memory_space<vmem>>, vector<8x8xf32>
      tpu.vector_store %arg12[%c0_18, %c0_19], %23 {strides = array<i32>} : memref<8x8xf32, #tpu.memory_space<vmem>>, vector<8x8xf32>,
    } else {
    }
    %c8_i32 = arith.constant 8 : i32
    %3 = arith.muli %arg2, %c8_i32 : i32
    %c8_i32_1 = arith.constant 8 : i32
    %4 = arith.muli %arg1, %c8_i32_1 : i32
    %c7_i32 = arith.constant 7 : i32
    %5 = arith.addi %4, %c7_i32 : i32
    %6 = arith.cmpi sle, %3, %5 : i32
    %7 = arith.extui %6 : i1 to i32
    %c0_i32_2 = arith.constant 0 : i32
    %8 = arith.cmpi ne, %7, %c0_i32_2 : i32
    scf.if %8 {
      %c0 = arith.constant 0 : index
      %c0_4 = arith.constant 0 : index
      %c0_5 = arith.constant 0 : index
      %12 = vector.load %arg4[%c0, %c0_4, %c0_5] : memref<1x8x8xf32, #tpu.memory_space<vmem>>, vector<1x8x8xf32>
      %13 = vector.shape_cast %12 : vector<1x8x8xf32> to vector<8x8xf32>
      %c0_6 = arith.constant 0 : index
      %c0_7 = arith.constant 0 : index
      %14 = vector.load %arg6[%c0_6, %c0_7] : memref<8x8xf32, #tpu.memory_space<vmem>>, vector<8x8xf32>
      %cst = arith.constant dense<0.000000e+00> : vector<8x8xf32>
      %15 = tpu.matmul %13, %14, %cst {dimension_numbers = #tpu.dot_dimension_numbers<[1], [0], [0], [1], [0, 0, 1, 1], [], []>} : vector<8x8xf32>, vector<8x8xf32>, vector<8x8xf32> -> vector<8x8xf32>
      %c0_8 = arith.constant 0 : index
      %c0_9 = arith.constant 0 : index
      %c0_10 = arith.constant 0 : index
      %16 = vector.load %arg4[%c0_8, %c0_9, %c0_10] : memref<1x8x8xf32, #tpu.memory_space<vmem>>, vector<1x8x8xf32>
      %17 = vector.shape_cast %16 : vector<1x8x8xf32> to vector<8x8xf32>
      %c0_11 = arith.constant 0 : index
      %c0_12 = arith.constant 0 : index
      %18 = vector.load %arg7[%c0_11, %c0_12] : memref<8x8xf32, #tpu.memory_space<vmem>>, vector<8x8xf32>
      %cst_13 = arith.constant dense<0.000000e+00> : vector<8x8xf32>
      %19 = tpu.matmul %17, %18, %cst_13 {dimension_numbers = #tpu.dot_dimension_numbers<[1], [0], [0], [1], [0, 0, 1, 1], [], []>} : vector<8x8xf32>, vector<8x8xf32>, vector<8x8xf32> -> vector<8x8xf32>
      %c8_i32_14 = arith.constant 8 : i32
      %20 = arith.muli %arg1, %c8_i32_14 : i32
      %21 = tpu.iota {dimensions = array<i32: 0>} : vector<8x8xi32>
      %22 = vector.broadcast %20 : i32 to vector<8x8xi32>
      %23 = arith.addi %22, %21 : vector<8x8xi32>
      %c8_i32_15 = arith.constant 8 : i32
      %24 = arith.muli %arg2, %c8_i32_15 : i32
      %25 = tpu.iota {dimensions = array<i32: 1>} : vector<8x8xi32>
      %26 = vector.broadcast %24 : i32 to vector<8x8xi32>
      %27 = arith.addi %26, %25 : vector<8x8xi32>
      %28 = arith.cmpi sgt, %27, %23 : vector<8x8xi32>
      %c0_16 = arith.constant 0 : index
      %c0_17 = arith.constant 0 : index
      %29 = vector.load %arg9[%c0_16, %c0_17] : memref<8x8xf32, #tpu.memory_space<vmem>>, vector<8x8xf32>
      %c0_18 = arith.constant 0 : index
      %c0_19 = arith.constant 0 : index
      %30 = vector.load %arg10[%c0_18, %c0_19] : memref<8x2xf32, #tpu.memory_space<vmem>>, vector<8x2xf32>
      %c0_20 = arith.constant 0 : index
      %c0_21 = arith.constant 0 : index
      %31 = vector.load %arg11[%c0_20, %c0_21] : memref<8x2xf32, #tpu.memory_space<vmem>>, vector<8x2xf32>
      %c0_22 = arith.constant 0 : index
      %c0_23 = arith.constant 0 : index
      %32 = vector.load %arg12[%c0_22, %c0_23] : memref<8x8xf32, #tpu.memory_space<vmem>>, vector<8x8xf32>
      %33 = vector.extract_strided_slice %29 {offsets = [0, 0], sizes = [8, 4], strides = [1, 1]} : vector<8x8xf32> to vector<8x4xf32>
      %34 = vector.extract_strided_slice %15 {offsets = [0, 0], sizes = [8, 4], strides = [1, 1]} : vector<8x8xf32> to vector<8x4xf32>
      %35 = vector.extract_strided_slice %19 {offsets = [0, 0], sizes = [8, 4], strides = [1, 1]} : vector<8x8xf32> to vector<8x4xf32>
      %cst_24 = arith.constant dense<0.000000e+00> : vector<8x8xf32>
      %36 = tpu.matmul %33, %34, %cst_24 {dimension_numbers = #tpu.dot_dimension_numbers<[1], [1], [0], [0], [0, 0, 1, 0], [], []>} : vector<8x4xf32>, vector<8x4xf32>, vector<8x8xf32> -> vector<8x8xf32>
      %cst_25 = arith.constant 0xFF800000 : f32
      %37 = vector.broadcast %cst_25 : f32 to vector<8x8xf32>
      %38 = arith.select %28, %37, %36 : vector<8x8xi1>, vector<8x8xf32>
      %39 = vector.extract_strided_slice %30 {offsets = [0, 0], sizes = [8, 1], strides = [1, 1]} : vector<8x2xf32> to vector<8x1xf32>
      %40 = vector.extract_strided_slice %31 {offsets = [0, 0], sizes = [8, 1], strides = [1, 1]} : vector<8x2xf32> to vector<8x1xf32>
      %cst_26 = arith.constant dense<0xFF800000> : vector<8xf32>
      %41 = vector.multi_reduction <maximumf>, %38, %cst_26 [1] : vector<8x8xf32> to vector<8xf32>
      %42 = vector.shape_cast %41 : vector<8xf32> to vector<8x1xf32>
      %43 = arith.maximumf %39, %42 : vector<8x1xf32>
      %44 = arith.subf %39, %43 : vector<8x1xf32>
      %45 = math.exp %44 : vector<8x1xf32>
      %46 = vector.broadcast %43 : vector<8x1xf32> to vector<8x8xf32>
      %47 = arith.subf %38, %46 : vector<8x8xf32>
      %48 = math.exp %47 : vector<8x8xf32>
      %49 = arith.mulf %45, %40 : vector<8x1xf32>
      %cst_27 = arith.constant dense<0.000000e+00> : vector<8xf32>
      %50 = vector.multi_reduction <add>, %48, %cst_27 [1] : vector<8x8xf32> to vector<8xf32>
      %51 = vector.shape_cast %50 : vector<8xf32> to vector<8x1xf32>
      %52 = arith.addf %49, %51 : vector<8x1xf32>
      %cst_28 = arith.constant dense<0.000000e+00> : vector<8x4xf32>
      %53 = tpu.matmul %48, %35, %cst_28 {dimension_numbers = #tpu.dot_dimension_numbers<[1], [0], [0], [1], [0, 0, 1, 1], [], []>} : vector<8x8xf32>, vector<8x4xf32>, vector<8x4xf32> -> vector<8x4xf32>
      %54 = vector.extract_strided_slice %32 {offsets = [0, 0], sizes = [8, 4], strides = [1, 1]} : vector<8x8xf32> to vector<8x4xf32>
      %55 = vector.broadcast %45 : vector<8x1xf32> to vector<8x4xf32>
      %56 = arith.mulf %55, %54 : vector<8x4xf32>
      %57 = arith.addf %56, %53 : vector<8x4xf32>
      %58 = vector.extract_strided_slice %29 {offsets = [0, 4], sizes = [8, 4], strides = [1, 1]} : vector<8x8xf32> to vector<8x4xf32>
      %59 = vector.extract_strided_slice %15 {offsets = [0, 4], sizes = [8, 4], strides = [1, 1]} : vector<8x8xf32> to vector<8x4xf32>
      %60 = vector.extract_strided_slice %19 {offsets = [0, 4], sizes = [8, 4], strides = [1, 1]} : vector<8x8xf32> to vector<8x4xf32>
      %cst_29 = arith.constant dense<0.000000e+00> : vector<8x8xf32>
      %61 = tpu.matmul %58, %59, %cst_29 {dimension_numbers = #tpu.dot_dimension_numbers<[1], [1], [0], [0], [0, 0, 1, 0], [], []>} : vector<8x4xf32>, vector<8x4xf32>, vector<8x8xf32> -> vector<8x8xf32>
      %cst_30 = arith.constant 0xFF800000 : f32
      %62 = vector.broadcast %cst_30 : f32 to vector<8x8xf32>
      %63 = arith.select %28, %62, %61 : vector<8x8xi1>, vector<8x8xf32>
      %64 = vector.extract_strided_slice %30 {offsets = [0, 1], sizes = [8, 1], strides = [1, 1]} : vector<8x2xf32> to vector<8x1xf32>
      %65 = vector.extract_strided_slice %31 {offsets = [0, 1], sizes = [8, 1], strides = [1, 1]} : vector<8x2xf32> to vector<8x1xf32>
      %cst_31 = arith.constant dense<0xFF800000> : vector<8xf32>
      %66 = vector.multi_reduction <maximumf>, %63, %cst_31 [1] : vector<8x8xf32> to vector<8xf32>
      %67 = vector.shape_cast %66 : vector<8xf32> to vector<8x1xf32>
      %68 = arith.maximumf %64, %67 : vector<8x1xf32>
      %69 = arith.subf %64, %68 : vector<8x1xf32>
      %70 = math.exp %69 : vector<8x1xf32>
      %71 = vector.broadcast %68 : vector<8x1xf32> to vector<8x8xf32>
      %72 = arith.subf %63, %71 : vector<8x8xf32>
      %73 = math.exp %72 : vector<8x8xf32>
      %74 = arith.mulf %70, %65 : vector<8x1xf32>
      %cst_32 = arith.constant dense<0.000000e+00> : vector<8xf32>
      %75 = vector.multi_reduction <add>, %73, %cst_32 [1] : vector<8x8xf32> to vector<8xf32>
      %76 = vector.shape_cast %75 : vector<8xf32> to vector<8x1xf32>
      %77 = arith.addf %74, %76 : vector<8x1xf32>
      %cst_33 = arith.constant dense<0.000000e+00> : vector<8x4xf32>
      %78 = tpu.matmul %73, %60, %cst_33 {dimension_numbers = #tpu.dot_dimension_numbers<[1], [0], [0], [1], [0, 0, 1, 1], [], []>} : vector<8x8xf32>, vector<8x4xf32>, vector<8x4xf32> -> vector<8x4xf32>
      %79 = vector.extract_strided_slice %32 {offsets = [0, 4], sizes = [8, 4], strides = [1, 1]} : vector<8x8xf32> to vector<8x4xf32>
      %80 = vector.broadcast %70 : vector<8x1xf32> to vector<8x4xf32>
      %81 = arith.mulf %80, %79 : vector<8x4xf32>
      %82 = arith.addf %81, %78 : vector<8x4xf32>
      %83 = tpu.concatenate %43, %68 in 1 : vector<8x1xf32>, vector<8x1xf32> -> vector<8x2xf32>
      %c0_34 = arith.constant 0 : index
      %c0_35 = arith.constant 0 : index
      %84 = vector.load %arg10[%c0_34, %c0_35] : memref<8x2xf32, #tpu.memory_space<vmem>>, vector<8x2xf32>
      tpu.vector_store %arg10[%c0_34, %c0_35], %83 {strides = array<i32>} : memref<8x2xf32, #tpu.memory_space<vmem>>, vector<8x2xf32>,
      %85 = tpu.concatenate %52, %77 in 1 : vector<8x1xf32>, vector<8x1xf32> -> vector<8x2xf32>
      %c0_36 = arith.constant 0 : index
      %c0_37 = arith.constant 0 : index
      %86 = vector.load %arg11[%c0_36, %c0_37] : memref<8x2xf32, #tpu.memory_space<vmem>>, vector<8x2xf32>
      tpu.vector_store %arg11[%c0_36, %c0_37], %85 {strides = array<i32>} : memref<8x2xf32, #tpu.memory_space<vmem>>, vector<8x2xf32>,
      %87 = tpu.concatenate %57, %82 in 1 : vector<8x4xf32>, vector<8x4xf32> -> vector<8x8xf32>
      %c0_38 = arith.constant 0 : index
      %c0_39 = arith.constant 0 : index
      %88 = vector.load %arg12[%c0_38, %c0_39] : memref<8x8xf32, #tpu.memory_space<vmem>>, vector<8x8xf32>
      tpu.vector_store %arg12[%c0_38, %c0_39], %87 {strides = array<i32>} : memref<8x8xf32, #tpu.memory_space<vmem>>, vector<8x8xf32>,
    } else {
    }
    %c1_i32 = arith.constant 1 : i32
    %9 = arith.cmpi eq, %arg2, %c1_i32 : i32
    %10 = arith.extui %9 : i1 to i32
    %c0_i32_3 = arith.constant 0 : i32
    %11 = arith.cmpi ne, %10, %c0_i32_3 : i32
    scf.if %11 {
      %c0 = arith.constant 0 : index
      %c0_4 = arith.constant 0 : index
      %12 = vector.load %arg12[%c0, %c0_4] : memref<8x8xf32, #tpu.memory_space<vmem>>, vector<8x8xf32>
      %c0_5 = arith.constant 0 : index
      %c0_6 = arith.constant 0 : index
      %13 = vector.load %arg11[%c0_5, %c0_6] : memref<8x2xf32, #tpu.memory_space<vmem>>, vector<8x2xf32>
      %14 = vector.extract_strided_slice %12 {offsets = [0, 0], sizes = [8, 4], strides = [1, 1]} : vector<8x8xf32> to vector<8x4xf32>
      %15 = vector.extract_strided_slice %13 {offsets = [0, 0], sizes = [8, 1], strides = [1, 1]} : vector<8x2xf32> to vector<8x1xf32>
      %16 = tpu.reciprocal %15 : vector<8x1xf32> -> vector<8x1xf32>
      %17 = vector.broadcast %16 : vector<8x1xf32> to vector<8x4xf32>
      %18 = arith.mulf %14, %17 : vector<8x4xf32>
      %19 = vector.extract_strided_slice %12 {offsets = [0, 4], sizes = [8, 4], strides = [1, 1]} : vector<8x8xf32> to vector<8x4xf32>
      %20 = vector.extract_strided_slice %13 {offsets = [0, 1], sizes = [8, 1], strides = [1, 1]} : vector<8x2xf32> to vector<8x1xf32>
      %21 = tpu.reciprocal %20 : vector<8x1xf32> -> vector<8x1xf32>
      %22 = vector.broadcast %21 : vector<8x1xf32> to vector<8x4xf32>
      %23 = arith.mulf %19, %22 : vector<8x4xf32>
      %24 = tpu.concatenate %18, %23 in 1 : vector<8x4xf32>, vector<8x4xf32> -> vector<8x8xf32>
      %c0_7 = arith.constant 0 : index
      %c0_8 = arith.constant 0 : index
      %c0_9 = arith.constant 0 : index
      %25 = vector.load %arg8[%c0_7, %c0_8, %c0_9] : memref<1x8x8xf32, #tpu.memory_space<vmem>>, vector<1x8x8xf32>
      %26 = vector.shape_cast %25 : vector<1x8x8xf32> to vector<8x8xf32>
      %27 = vector.shape_cast %24 : vector<8x8xf32> to vector<1x8x8xf32>
      tpu.vector_store %arg8[%c0_7, %c0_8, %c0_9], %27 {strides = array<i32>} : memref<1x8x8xf32, #tpu.memory_space<vmem>>, vector<1x8x8xf32>,
    } else {
    }
    return
  }
  func.func @transform_0(%arg0: i32, %arg1: i32, %arg2: i32) -> (i32, i32, i32) {
    %c0_i32 = arith.constant 0 : i32
    %c0_i32_0 = arith.constant 0 : i32
    return %arg0, %arg1, %c0_i32 : i32, i32, i32
  }
  func.func @transform_1(%arg0: i32, %arg1: i32, %arg2: i32) -> (i32, i32, i32) {
    %c0_i32 = arith.constant 0 : i32
    %c0_i32_0 = arith.constant 0 : i32
    return %arg0, %arg2, %c0_i32 : i32, i32, i32
  }
  func.func @transform_2(%arg0: i32, %arg1: i32, %arg2: i32) -> (i32, i32) {
    %c0_i32 = arith.constant 0 : i32
    %c0_i32_0 = arith.constant 0 : i32
    %c0_i32_1 = arith.constant 0 : i32
    return %c0_i32, %c0_i32_0 : i32, i32
  }
  func.func @transform_3(%arg0: i32, %arg1: i32, %arg2: i32) -> (i32, i32) {
    %c0_i32 = arith.constant 0 : i32
    %c0_i32_0 = arith.constant 0 : i32
    %c0_i32_1 = arith.constant 0 : i32
    return %c0_i32, %c0_i32_0 : i32, i32
  }
  func.func @transform_4(%arg0: i32, %arg1: i32, %arg2: i32) -> (i32, i32) {
    %c0_i32 = arith.constant 0 : i32
    %c0_i32_0 = arith.constant 0 : i32
    %c0_i32_1 = arith.constant 0 : i32
    return %c0_i32, %c0_i32_0 : i32, i32
  }
  func.func @transform_5(%arg0: i32, %arg1: i32, %arg2: i32) -> (i32, i32, i32) {
    %c0_i32 = arith.constant 0 : i32
    %c0_i32_0 = arith.constant 0 : i32
    return %arg0, %arg1, %c0_i32 : i32, i32, i32
  }
}

</mosaic_0001>

<bundles_post_ra>
// kernel: tpu_custom_call.1
= control target key start
LH: loop header
LB: loop body
LE: loop exit
PB: predicated region body
PF: predicated region fallthrough
CT: control target
= control target key end

     0   :  { %s1307_s18 = smov 0   ;;  %s1309_s19 = smov 0   ;;  %s1450_s0 = inlined_call_operand.vmem [shape: f32[2,16,8], index: 0, kind: input, shape index: {}]   ;;  %s1451_s1 = inlined_call_operand.vmem [shape: f32[2,16,8], index: 1, kind: input, shape index: {}]   ;;  %s1452_s2 = inlined_call_operand.vmem [shape: f32[8,8], index: 2, kind: input, shape index: {}]   ;;  %s1453_s3 = inlined_call_operand.vmem [shape: f32[8,8], index: 3, kind: input, shape index: {}]   ;;  %s1454_s4 = inlined_call_operand.vmem [shape: f32[8,8], index: 4, kind: input, shape index: {}]   ;;  %s1455_s5 = inlined_call_operand.vmem [shape: f32[2,16,8], index: 5, kind: output, shape index: {}]  }
   0x1   :  { %s1311_s20 = smov 0   ;;  %s1313_s21 = smov 0  }
   0x2   :  { %s1315_s22 = smov 0   ;;  %s1317_s23 = smov 0  }
   0x3   :  { %s1319_s24 = smov 0  }
   0x4 LB: > { %s27_s25 = sadd.s32 1, %s1252_s21  ;;  %s30_s26 = sadd.s32 1, %s1256_s22  ;;  %s1264_s24 = sphi %s1319_s24, %s15_s24   ;;  %s1260_s23 = sphi %s1317_s23, %s1463_s23   ;;  %s1256_s22 = sphi %s1315_s22, %s1462_s22   ;;  %s1252_s21 = sphi %s1313_s21, %s1461_s21   ;;  %s1248_s20 = sphi %s1311_s20, %s1460_s20   ;;  %s1244_s19 = sphi %s1309_s19, %s1459_s19   ;;  %s1240_s18 = sphi %s1307_s18, %s1458_s18  }
   0x5   : > { %p28_p0 = scmp.ge.s32.totalorder %s27_s25, 2  ;;  %p1056_p1 = scmp.ge.s32.totalorder %s1264_s24, 1 }
   0x6   : > { %p228_p2 = scmp.lt.s32.totalorder %s1264_s24, 9  ;;  %s34_s27 = sadd.s32 1, %s1260_s23 }
   0x7   : > { %s1465_s25 = smov (%p28_p0, %s27_s25), 0  ;;  %s1467_s26 = smov (!%p28_p0, %s30_s26), %s1256_s22 }
   0x8   : > { %p229_p3 = pnand %p1056_p1, %p228_p2  ;;  %p32_p4 = scmp.ge.s32.totalorder %s1467_s26, 2 }
   0x9   : > { %p270_p6 = scmp.lt.s32.totalorder (!%p229_p3), %s1248_s20, 1  ;;  %p272_p7 = scmp.lt.s32.totalorder (!%p229_p3), %s1244_s19, 1 }
   0xa   : > { %s1469_s26 = smov (%p32_p4, %s1467_s26), 0  ;;  %s1471_s27 = smov (!%p32_p4, %s34_s27), %s1260_s23 }
   0xb   : > { %p36_p5 = scmp.ge.s32.totalorder %s1471_s27, 2  ;;  %232 = sbr.rel (%p229_p3) target bundleno = 1560 (0x618), region = 40 }
   0xc   : > { %p280_p8 = scmp.lt.s32.totalorder (!%p229_p3), %s1240_s18, 1  ;;  %p1063_p9 = scmp.ne.s32.totalorder (!%p229_p3), %s1240_s18, 0 }
   0xd   : > { %s1473_s27 = smov (%p36_p5, %s1471_s27), 0 }
   0xe   : > { %1456 = sst [smem:[#allocation6_spill]] %s1473_s27 }
  0x12   : > { %s1475_s20 = smov (!%p270_p6, %s1248_s20), 1  ;;  %vm376_vm0 = vcmask (!%p1063_p9), 15360   ;;  %v299_v0 = vld [vmem:[%s1452_s2] sm:$0xff] (!%p1063_p9)  ;;  %v1266_v2 = vmov (!%p1063_p9), 0.0   ;;  %v1267_v3 = vmov (!%p1063_p9), -inf   ;;  %vm1268_vm1 = vmmov (!%p1063_p9), 0  }
  0x13   : > { %s273_s28 = scalar_select %p272_p7, %s1244_s19, 1 }
  0x14   : > { %s1057_s29 = sshll.u32 %s1475_s20, 1  ;;  %1093 = vmatprep.subr.mxu0 (!%p1063_p9), %v1266_v2  ;;  %377 = vst.msk [vmem:[#allocation3] sm:$0xff] (!%p1063_p9), %vm376_vm0, %v1267_v3  ;;  %378 = vst.msk [vmem:[#allocation4] sm:$0xff] (!%p1063_p9), %vm376_vm0, %v1266_v2  ;;  %1095 = vmatprep.mubr.msk.f32.mxu0 (!%p1063_p9), %vm1268_vm1, %v1266_v2  ;;  %vm300_vm2 = vcmask (!%p1063_p9), 64512  }
  0x15   : > { %s275_s30 = sadd.s32 %s1057_s29, %s273_s28  ;;  %1094 = vmatpush3.msra.mxu0 (!%p1063_p9), %v299_v0  ;;  %379 = vst.msk [vmem:[#allocation5] sm:$0xff] (!%p1063_p9), %vm300_vm2, %v1266_v2 }
  0x16   : > { %s1058_s6 = sshll.u32 %s275_s30, 3  ;;  %297 = sbr.rel (%p1063_p9) target bundleno = 241 (0xf1), region = 44 }
  0x17   : > { %s277_s9 = scalar_lea.vmem %s1450_s0, %s1058_s6  ;;  %s1362_s12 = scalar_lea.vmem %s1455_s5, %s1058_s6 }
  0x18   : > { %s281_s13 = scalar_select %p280_p8, %s1240_s18, 1 }
  0x19   : > { %v298_v1 = vld [vmem:[%s277_s9] sm:$0xff] (!%p1063_p9) }
  0x1a   : > { %s283_s14 = sadd.s32 %s1057_s29, %s281_s13  ;;  %1096 = vmatmul.mubr.msk.f32.vlgmr.msra.gmra.mrb[0].mxu0 (!%p1063_p9), %vm300_vm2, %v298_v1 }
  0x1b   : > { %s1060_s15 = sshll.u32 %s283_s14, 3 }
  0x1c   : > { %s285_s27 = scalar_lea.vmem %s1451_s1, %s1060_s15 }
  0xed   : > { %v370_v4 = vpop.f32.mrb[0].mxu0 }
  0xee   : > { %v374_v5 = vmul.f32 0.5, %v370_v4  ;;  %v1097_v6 = vpop.f32.mrb[1].mxu0 }
  0xf0   : > { %375 = vst.msk [vmem:[#allocation2] sm:$0xff] %vm300_vm2, %v374_v5 }
  0xf1 PF: > { %s1065_s29 = sshll.u32 %s1240_s18, 3  ;;  %s1066_s30 = sshll.u32 %s1244_s19, 3 }
  0xf2   : > { %s382_s6 = sadd.s32 7, %s1066_s30 }
  0xf3   : > { %p1067_p10 = scmp.gt.s32.totalorder %s1065_s29, %s382_s6 }
  0xf4   : > { %v388_v7 = vld [vmem:[%s1453_s3] sm:$0xff] (!%p1067_p10)  ;;  %vm389_vm3 = vcmask (!%p1067_p10), 64512   ;;  %v1269_v9 = vmov (!%p1067_p10), 0.0   ;;  %vm1270_vm4 = vmmov (!%p1067_p10), 0   ;;  %vm547_vm5 = vcmask (!%p1067_p10), 31744   ;;  %v544_v35 = vld [vmem:[#allocation3] sm:$0xff] (!%p1067_p10) }
  0xf5   : > { %386 = sbr.rel (%p1067_p10) target bundleno = 1410 (0x582), region = 48  ;;  %v387_v8 = vld [vmem:[%s285_s27] sm:$0xff] (!%p1067_p10)  ;;  %1098 = vmatprep.subr.mxu0 (!%p1067_p10), %v1269_v9  ;;  %1100 = vmatprep.mubr.msk.f32.mxu0 (!%p1067_p10), %vm1270_vm4, %v1269_v9  ;;  %s1271_s27 = smov (!%p1067_p10), 124   ;;  %v534_v16 = vlaneseq (!%p1067_p10)  ;;  %v536_v19 = vstv (!%p1067_p10), %s1066_s30  ;;  %v540_v20 = vstv (!%p1067_p10), %s1065_s29  ;;  %v1272_v27 = vmov (!%p1067_p10), 0   ;;  %v545_v61 = vld [vmem:[#allocation4] sm:$0xff] (!%p1067_p10) }
  0xf6   : > { %1099 = vmatpush3.msra.mxu0 (!%p1067_p10), %v388_v7  ;;  %1103 = vmatprep.subr.mxu1 (!%p1067_p10), %v1269_v9  ;;  %v463_v13 = vld [vmem:[%s1454_s4] sm:$0xff] (!%p1067_p10)  ;;  %v1273_v34 = vmov (!%p1067_p10), 1   ;;  %vm912_vm7 = vcmask (!%p1067_p10), 7168   ;;  %vm914_vm8 = vcmask (!%p1067_p10), 15360   ;;  %s1274_s19 = smov (!%p1067_p10), 4   ;;  %v546_v7 = vld [vmem:[#allocation5] sm:$0xff] (!%p1067_p10) }
  0xf7   : > { %1101 = vmatmul.mubr.msk.f32.vlgmr.msra.gmra.mrb[0].mxu0 (!%p1067_p10), %vm389_vm3, %v387_v8  ;;  %1108 = vmatprep.subr.mxu0 (!%p1067_p10), %v1269_v9  ;;  %v543_v12 = vld [vmem:[#allocation2] sm:$0xff] (!%p1067_p10)  ;;  %v535_v17 = vshrl.u32 (!%p1067_p10), %v534_v16, 7  ;;  %v539_v18 = vand.u32 (!%p1067_p10), 127, %v534_v16 }
  0xf8   : > { %1110 = vmatprep.mubr.msk.f32.mxu0 (!%p1067_p10), %vm1270_vm4, %v1269_v9  ;;  %1105 = vmatprep.mubr.msk.f32.mxu1 (!%p1067_p10), %vm1270_vm4, %v1269_v9 }
  0xf9   : > { %1104 = vmatpush3.msra.mxu1 (!%p1067_p10), %v463_v13  ;;  %v537_v21 = vadd.s32 (!%p1067_p10), %v536_v19, %v535_v17  ;;  %v541_v22 = vadd.s32 (!%p1067_p10), %v540_v20, %v539_v18  ;;  %1195 = vset.pattern.permute.xlu0 (!%p1067_p10), %v1272_v27 }
  0xfa   : > { %1106 = vmatmul.mubr.msk.f32.vlgmr.msra.gmra.mrb[0].mxu1 (!%p1067_p10), %vm389_vm3, %v387_v8  ;;  %1113 = vmatprep.subr.mxu1 (!%p1067_p10), %v1269_v9 }
  0xfb   : > { %1115 = vmatprep.mubr.msk.f32.mxu1 (!%p1067_p10), %vm1270_vm4, %v1269_v9  ;;  %vm542_vm6 = vcmp.gt.s32.totalorder (!%p1067_p10), %v541_v22, %v537_v21  ;;  %1196 = vset.pattern.permute.xlu1 (!%p1067_p10), %v1273_v34 }
 0x1ca   : > { %v459_v10 = vpop.f32.mrb[0].mxu0 }
 0x1cb   : > { %727 = vrot.lane.b32.xlu0 %v459_v10, %s1271_s27  ;;  %v1102_v11 = vpop.f32.mrb[1].mxu0  ;;  %1109 = vmatpush3.xpose.msk.msra.mxu0 %vm547_vm5, %v459_v10 }
 0x1cc   : > { %1118 = vmatprep.subr.mxu0 %v1269_v9 }
 0x1cd   : > { %v530_v28 = vpop.f32.mrb[0].mxu1 }
 0x1ce   : > { %1111 = vmatmul.mubr.msk.f32.vlgmr.msra.gmra.mrb[2].mxu0 %vm547_vm5, %v543_v12  ;;  %v1107_v29 = vpop.f32.mrb[1].mxu1  ;;  %1114 = vmatpush3.msra.mxu1 %v530_v28 }
 0x1cf   : > { %725 = vrot.lane.b32.xlu0 %v543_v12, %s1271_s27  ;;  %1120 = vmatprep.mubr.msk.f32.mxu0 %vm1270_vm4, %v1269_v9 }
 0x1d0   : > { %1123 = vmatprep.subr.mxu1 %v1269_v9 }
 0x23d   : > { %v728_v14 = vpop.permute.xlu0 %727 }
 0x23e   : > { %1119 = vmatpush3.xpose.msk.msra.mxu0 %vm547_vm5, %v728_v14 }
 0x241   : > { %v726_v15 = vpop.permute.xlu0 %725 }
 0x242   : > { %1121 = vmatmul.mubr.msk.f32.vlgmr.msra.gmra.mrb[4].mxu0 %vm547_vm5, %v726_v15 }
 0x2a1   : > { %v620_v23 = vpop.f32.mrb[2].mxu0 }
 0x2a2   : > { %v624_v24 = vsel %vm542_vm6, -inf, %v620_v23  ;;  %v1112_v25 = vpop.f32.mrb[3].mxu0 }
 0x2a3   : > { %v625_v26 = vsel %vm389_vm3, %v624_v24, -inf }
 0x2a4   : > { %626 = vmax.xlane.f32.xlu1 %v625_v26 }
 0x315   : > { %v799_v30 = vpop.f32.mrb[4].mxu0 }
 0x316   : > { %v803_v31 = vsel %vm542_vm6, -inf, %v799_v30  ;;  %v1122_v32 = vpop.f32.mrb[5].mxu0 }
 0x317   : > { %v804_v33 = vsel %vm389_vm3, %v803_v31, -inf }
 0x318   : > { %805 = vmax.xlane.f32.xlu1 %v804_v33 }
 0x331   : > { %v627_v36 = vpop.xlane.xlu1 %626 }
 0x332   : > { %v628_v37 = vmax.f32 %v544_v35, %v627_v36 }
 0x334   : > { %v629_v38 = vsub.f32 %v544_v35, %v628_v37  ;;  %634 = vperm.xlu0 %1195, %v628_v37  }
 0x336   : > { %v630_v39 = vmul.f32 1.442695, %v629_v38 }
 0x338   : > { %1198 = vpow2.f32 %v630_v39  ;;  %825 = vrot.lane.b32.xlu0 %v530_v28, %s1271_s27 }
 0x342   : > { %v1199_v40 = vpop.eup %1198 }
 0x343   : > { %720 = vperm.xlu0 %1195, %v1199_v40   ;;  %v640_v63 = vmul.f32 %v1199_v40, %v545_v61 }
 0x347   : > { %1197 = vset.pattern.permute.xlu0 %v1273_v34 }
 0x3a5   : > { %v806_v41 = vpop.xlane.xlu1 %805 }
 0x3a6   : > { %v807_v42 = vmax.f32 %v544_v35, %v806_v41 }
 0x3a8   : > { %v913_v43 = vsel %vm912_vm7, %v628_v37, %v807_v42  ;;  %813 = vperm.xlu1 %1196, %v807_v42   ;;  %v808_v54 = vsub.f32 %v544_v35, %v807_v42 }
 0x3a9   : > { %915 = vst.msk [vmem:[#allocation3] sm:$0xff] %vm914_vm8, %v913_v43 }
 0x3aa   : > { %v809_v56 = vmul.f32 1.442695, %v808_v54 }
 0x3b3   : > { %v635_v44 = vpop.permute.xlu0 %634 }
 0x3b4   : > { %v637_v45 = vsub.f32 %v624_v24, %v635_v44 }
 0x3b6   : > { %v638_v46 = vmul.f32 1.442695, %v637_v45 }
 0x3b7   : > { %v826_v49 = vpop.permute.xlu0 %825 }
 0x3b8   : > { %1200 = vpow2.f32 %v638_v46 }
 0x3c2   : > { %v1201_v47 = vpop.eup %1200  ;;  %v721_v60 = vpop.permute.xlu0 %720 }
 0x3c3   : > { %1116 = vmatmul.mubr.msk.f32.vlgmr.msra.gmra.mrb[2].mxu1 %vm389_vm3, %v1201_v47  ;;  %v641_v48 = vsel %vm389_vm3, %v1201_v47, 0.0 }
 0x3c4   : > { %642 = vadd.xlane.f32.xlu0 %v641_v48  ;;  %1124 = vmatpush3.msra.mxu1 %v826_v49 }
 0x3c5   : > { %1125 = vmatprep.mubr.msk.f32.mxu1 %vm1270_vm4, %v1269_v9  ;;  %v723_v9 = vmul.f32 %v721_v60, %v546_v7 }
 0x427   : > { %v814_v50 = vpop.permute.xlu1 %813 }
 0x428   : > { %v816_v51 = vsub.f32 %v803_v31, %v814_v50 }
 0x42a   : > { %v817_v52 = vmul.f32 1.442695, %v816_v51 }
 0x42c   : > { %1202 = vpow2.f32 %v817_v52 }
 0x42d   : > { %1204 = vpow2.f32 %v809_v56 }
 0x436   : > { %v1203_v53 = vpop.eup %1202 }
 0x437   : > { %1126 = vmatmul.mubr.msk.f32.vlgmr.msra.gmra.mrb[4].mxu1 %vm389_vm3, %v1203_v53  ;;  %v820_v55 = vsel %vm389_vm3, %v1203_v53, 0.0  ;;  %v1205_v57 = vpop.eup %1204 }
 0x438   : > { %821 = vadd.xlane.f32.xlu1 %v820_v55  ;;  %v819_v0 = vmul.f32 %v1205_v57, %v545_v61 }
 0x449   : > { %903 = vperm.xlu1 %1196, %v1205_v57  }
 0x451   : > { %v643_v62 = vpop.xlane.xlu0 %642 }
 0x452   : > { %v644_v2 = vadd.f32 %v643_v62, %v640_v63 }
 0x496   : > { %v714_v58 = vpop.f32.mrb[2].mxu1 }
 0x497   : > { %v1117_v59 = vpop.f32.mrb[3].mxu1  ;;  %v724_v12 = vadd.f32 %v723_v9, %v714_v58 }
 0x4c5   : > { %v822_v1 = vpop.xlane.xlu1 %821 }
 0x4c6   : > { %v823_v3 = vadd.f32 %v822_v1, %v819_v0 }
 0x4c8   : > { %v916_v4 = vsel %vm912_vm7, %v644_v2, %v823_v3 }
 0x4c9   : > { %917 = vst.msk [vmem:[#allocation4] sm:$0xff] %vm914_vm8, %v916_v4  ;;  %v904_v8 = vpop.permute.xlu1 %903 }
 0x4ca   : > { %v906_v10 = vmul.f32 %v904_v8, %v546_v7 }
 0x50a   : > { %v897_v5 = vpop.f32.mrb[4].mxu1 }
 0x50b   : > { %908 = vrot.lane.b32.xlu0 %v897_v5, %s1274_s19  ;;  %v1127_v6 = vpop.f32.mrb[5].mxu1 }
 0x57d   : > { %v909_v11 = vpop.permute.xlu0 %908 }
 0x57e   : > { %v911_v13 = vadd.f32 %v909_v11, %v906_v10 }
 0x580   : > { %v918_v14 = vsel %vm547_vm5, %v724_v12, %v911_v13 }
 0x581   : > { %919 = vst.msk [vmem:[#allocation5] sm:$0xff] %vm389_vm3, %v918_v14 }
 0x582 PF: > { %p1076_p11 = scmp.ne.s32.totalorder %s1240_s18, 1 }
 0x583   : > { %v925_v15 = vld [vmem:[#allocation4] sm:$0xff] (!%p1076_p11)  ;;  %v1275_v16 = vmov (!%p1076_p11), 0   ;;  %v1276_v18 = vmov (!%p1076_p11), 1   ;;  %vm938_vm9 = vcmask (!%p1076_p11), 31744   ;;  %vm940_vm10 = vcmask (!%p1076_p11), 64512  }
 0x584   : > { %923 = sbr.rel (%p1076_p11) target bundleno = 1560 (0x618), region = 52  ;;  %1206 = vset.pattern.permute.xlu0 (!%p1076_p11), %v1275_v16  ;;  %1208 = vrcp.f32 (!%p1076_p11), %v925_v15 }
 0x588   : > { %v924_v20 = vld [vmem:[#allocation5] sm:$0xff] (!%p1076_p11) }
 0x58e   : > { %v1209_v17 = vpop.eup %1208 }
 0x58f   : > { %929 = vperm.xlu0 %1206, %v1209_v17  }
 0x593   : > { %1207 = vset.pattern.permute.xlu0 %v1276_v18 }
 0x594   : > { %934 = vperm.xlu0 %1207, %v1209_v17  }
 0x60e   : > { %v930_v19 = vpop.permute.xlu0 %929 }
 0x60f   : > { %v932_v22 = vmul.f32 %v930_v19, %v924_v20 }
 0x613   : > { %v935_v21 = vpop.permute.xlu0 %934 }
 0x614   : > { %v937_v23 = vmul.f32 %v935_v21, %v924_v20 }
 0x616   : > { %v939_v24 = vsel %vm938_vm9, %v932_v22, %v937_v23 }
 0x617   : > { %941 = vst.msk [vmem:[%s1362_s12] sm:$0xff] %vm940_vm10, %v939_v24 }
 0x618 PF: > { %s15_s24 = sadd.s32 1, %s1264_s24   ;;  %s1457_s11 = sld [smem:[#allocation6_spill]] }
 0x619   : > { %p12_p12 = scmp.ge.s32.totalorder %s15_s24, 10   ;;  %s1458_s18 = smov %s1252_s21 }
 0x61a   : > { %s1459_s19 = smov %s1256_s22  ;;  %s1460_s20 = smov %s1260_s23 }
 0x61b   : > { %s1461_s21 = smov %s1465_s25  ;;  %s1462_s22 = smov %s1469_s26 }
 0x61c   :  { %14 = sbr.rel (!%p12_p12) target bundleno = 4 (0x4), region = 85 }
 0x61e   : > { %s1463_s23 = smov %s1457_s11 }

</bundles_post_ra>
